<compile_context>
chip_gen: v7x
topology: tpu7x:2x2x1
jax: 0.10.0
libtpu: 0.0.40
codegen_flags: <defaults>
</compile_context>

<pallas_src>
import functools

import jax
import jax.numpy as jnp
from jax import lax
from jax.experimental import pallas as pl
from jax.experimental.pallas import tpu as pltpu


# --------------------------------------------------------------------------- #
# Fused kernel: B_TILE batch elements per grid step, everything stays in VMEM.
# --------------------------------------------------------------------------- #
def _fused_kernel(H, x_ref, b1c_ref, b1v_ref, b2c_ref, b2v_ref,
                  pool_ref, gp_ref, bp_ref, out_ref):
    R = x_ref.shape[0]                              # B_TILE * H rows
    x = x_ref[...].astype(jnp.float32)              # (R, W*Cin) f32

    # Per-image row masks (prevent halo wrap across image boundaries).
    row = lax.broadcasted_iota(jnp.int32, (R, 1), 0)
    row_in_img = row % H
    not_first = row_in_img != 0                     # row i-1 exists within image
    not_last = row_in_img != (H - 1)                # row i+1 exists within image

    def conv3x3(a, bcat_ref, bias_ref):
        # a: (R, K) f32.  Row halo via XLU roll + VPU mask (MXU stays free).
        down = jnp.where(not_first, pltpu.roll(a, 1, 0), 0.0)       # a[i-1]
        up = jnp.where(not_last, pltpu.roll(a, R - 1, 0), 0.0)      # a[i+1]
        # One matmul for all 3 vertical taps: K = 3*W*Cin.
        lhs = jnp.concatenate([down, a, up], axis=-1).astype(jnp.bfloat16)
        acc = jnp.dot(lhs, bcat_ref[...], preferred_element_type=jnp.float32)
        return jnp.maximum(acc + bias_ref[...], 0.0)                # (R, W*Cout) f32

    a1 = conv3x3(x, b1c_ref, b1v_ref)               # (R, W*C1) f32
    a2 = conv3x3(a1, b2c_ref, b2v_ref)              # (R, W*C2) f32

    # Block-diagonal mean-pool over rows on the MXU, then the projection
    # (column pooling + W_proj^T are folded into gp).
    pooled = jnp.dot(pool_ref[...], a2, preferred_element_type=jnp.float32)   # (B_TILE, W*C2)
    hid = jnp.dot(pooled, gp_ref[...], preferred_element_type=jnp.float32)    # (B_TILE, P_PAD)
    out_ref[0] = hid + bp_ref[...]


# --------------------------------------------------------------------------- #
# One-time host-side weight preprocessing (plain JAX, done once).
# --------------------------------------------------------------------------- #
def _band_matrices_cat(w_hwio, W):
    """Fold the 3 horizontal taps + input channels of a 3x3 'same' conv into
    ONE banded matrix Bcat of shape (3*W*Cin, W*Cout) such that
        out_row[i] = [x_row[i-1] | x_row[i] | x_row[i+1]] @ Bcat
    where x_row is a row flattened as (W*Cin), zero padding along W handled
    implicitly by the band structure and along H by the caller's masks."""
    kh, kw, cin, cout = w_hwio.shape
    mats = []
    for dy in range(kh):
        B = jnp.zeros((W * cin, W * cout), w_hwio.dtype)
        for j in range(W):                        # output column
            for dx in range(kw):
                p = j + dx - 1                    # input column feeding column j
                if 0 <= p < W:
                    B = B.at[p * cin:(p + 1) * cin,
                             j * cout:(j + 1) * cout].set(w_hwio[dy, dx])
        mats.append(B)
    return jnp.concatenate(mats, axis=0)          # (3*W*cin, W*cout)


def prepare_operands(params, H, W):
    f32, bf16 = jnp.float32, jnp.bfloat16
    w1 = jnp.transpose(params["w1"], (2, 3, 1, 0)).astype(bf16)   # OIHW -> HWIO
    w2 = jnp.transpose(params["w2"], (2, 3, 1, 0)).astype(bf16)
    return dict(
        b1c=_band_matrices_cat(w1, W),                            # (3*W*Cin, W*C1)
        b1v=jnp.tile(params["b1"].astype(f32), W)[None, :],       # (1, W*C1)
        b2c=_band_matrices_cat(w2, W),                            # (3*W*C1, W*C2)
        b2v=jnp.tile(params["b2"].astype(f32), W)[None, :],       # (1, W*C2)
        gp=jnp.tile(params["wp"].astype(f32).T, (W, 1)),          # (W*C2, P)
        bp=params["bp"].astype(f32)[None, :],                     # (1, P)
    )


# --------------------------------------------------------------------------- #
# Public forward: accepts PyTorch-style NCHW input, returns (N, P) features.
# --------------------------------------------------------------------------- #
def hook_wrapper_forward(x_nchw, ops, b_tile=None):
    N, cin, H, W = x_nchw.shape
    wc = W * cin
    x_nhwc = jnp.transpose(x_nchw, (0, 2, 3, 1)).astype(jnp.bfloat16)

    if b_tile is None:
        # Fill the MXU M dim (~256 rows) while keeping >= 2 grid steps so both
        # v7x TensorCores get work.
        b_tile = max(1, min(max(1, 256 // H), pl.cdiv(N, 2)))
    steps = pl.cdiv(N, b_tile)
    n_pad = steps * b_tile
    if n_pad != N:
        x_nhwc = jnp.pad(x_nhwc, ((0, n_pad - N), (0, 0), (0, 0), (0, 0)))
    x_rows = x_nhwc.reshape(n_pad * H, wc)          # images stacked along rows

    b1c, b1v = ops["b1c"], ops["b1v"]
    b2c, b2v = ops["b2c"], ops["b2v"]
    gp, bp = ops["gp"], ops["bp"]
    p = bp.shape[-1]
    p_pad = pl.cdiv(max(p, 128), 128) * 128         # lane-dense output block
    gp_pad = jnp.pad(gp, ((0, 0), (0, p_pad - p)))
    bp_pad = jnp.pad(bp, ((0, 0), (0, p_pad - p)))

    # Block-diagonal mean-pool matrix: (B_TILE, B_TILE*H), 1/(H*W) within each
    # image's own rows (never mixes rows across images in a batch tile).
    r = b_tile * H
    img_of_row = lax.broadcasted_iota(jnp.int32, (b_tile, r), 1) // H
    img_id = lax.broadcasted_iota(jnp.int32, (b_tile, r), 0)
    pool = jnp.where(img_of_row == img_id, 1.0 / (H * W), 0.0).astype(jnp.float32)

    def full_spec(arr):   # whole array as one block, resident in VMEM
        return pl.BlockSpec(arr.shape, lambda n, nd=arr.ndim: (0,) * nd)

    out = pl.pallas_call(
        functools.partial(_fused_kernel, H),
        grid=(steps,),
        in_specs=[
            pl.BlockSpec((b_tile * H, wc), lambda n: (n, 0)),
            full_spec(b1c), full_spec(b1v), full_spec(b2c), full_spec(b2v),
            full_spec(pool), full_spec(gp_pad), full_spec(bp_pad),
        ],
        out_specs=pl.BlockSpec((1, b_tile, p_pad), lambda n: (n, 0, 0)),
        out_shape=jax.ShapeDtypeStruct((steps, b_tile, p_pad), jnp.float32),
        compiler_params=pltpu.CompilerParams(
            dimension_semantics=("parallel",)),
    )(x_rows, b1c, b1v, b2c, b2v, pool, gp_pad, bp_pad)
    return out.reshape(n_pad, p_pad)[:N, :p]


# --------------------------------------------------------------------------- #
# Pure-JAX reference (independent of the banded formulation) for verification.
# --------------------------------------------------------------------------- #
def reference_forward(x_nchw, params):
    bf16, f32 = jnp.bfloat16, jnp.float32
    x = jnp.transpose(x_nchw, (0, 2, 3, 1)).astype(bf16)

    def conv(a, w_oihw, b):
        w = jnp.transpose(w_oihw, (2, 3, 1, 0)).astype(bf16)
        y = jax.lax.conv_general_dilated(
            a, w, window_strides=(1, 1), padding="SAME",
            dimension_numbers=("NHWC", "HWIO", "NHWC"),
            preferred_element_type=f32)
        return jnp.maximum(y + b.astype(f32), 0.0)

    a1 = conv(x, params["w1"], params["b1"]).astype(bf16)
    a2 = conv(a1, params["w2"], params["b2"])
    pooled = jnp.mean(a2, axis=(1, 2))                         # (N, C2) f32
    return pooled @ params["wp"].astype(f32).T + params["bp"].astype(f32)


if __name__ == "__main__":
    N, Cin, H, W = 2, 4, 16, 16
    C1, C2, P = 8, 16, 32

    key = jax.random.PRNGKey(0)
    ks = jax.random.split(key, 7)
    params = dict(
        w1=0.1 * jax.random.normal(ks[0], (C1, Cin, 3, 3), jnp.float32),
        b1=0.1 * jax.random.normal(ks[1], (C1,), jnp.float32),
        w2=0.1 * jax.random.normal(ks[2], (C2, C1, 3, 3), jnp.float32),
        b2=0.1 * jax.random.normal(ks[3], (C2,), jnp.float32),
        wp=0.1 * jax.random.normal(ks[4], (P, C2), jnp.float32),
        bp=0.1 * jax.random.normal(ks[5], (P,), jnp.float32),
    )
    x = jax.random.normal(ks[6], (N, Cin, H, W), jnp.float32)

    ops = prepare_operands(params, H, W)               # one-time weight prep
    out = jax.jit(hook_wrapper_forward)(x, ops)
    out = jax.block_until_ready(out)

    ref = reference_forward(x, params)
    assert out.shape == (N, P), out.shape
    max_err = jnp.max(jnp.abs(out - ref))
    assert jnp.allclose(out, ref, rtol=3e-2, atol=3e-2), f"max abs err {max_err}"
    print("KERNEL_OK")
</pallas_src>

<mosaic_0001>
module attributes {stable_mosaic.version = 11 : i64} {
  func.func @_fused_kernel(%arg0: i32, %arg1: memref<16x64xbf16, #tpu.memory_space<vmem>>, %arg2: memref<192x128xbf16, #tpu.memory_space<vmem>>, %arg3: memref<1x128xf32, #tpu.memory_space<vmem>>, %arg4: memref<384x256xbf16, #tpu.memory_space<vmem>>, %arg5: memref<1x256xf32, #tpu.memory_space<vmem>>, %arg6: memref<1x16xf32, #tpu.memory_space<vmem>>, %arg7: memref<256x128xf32, #tpu.memory_space<vmem>>, %arg8: memref<1x128xf32, #tpu.memory_space<vmem>>, %arg9: memref<1x1x128xf32, #tpu.memory_space<vmem>>) attributes {dimension_semantics = [#tpu.dimension_semantics<parallel>], iteration_bounds = array<i64: 2>, scalar_prefetch = 0 : i64, scratch_operands = 0 : i64, tpu.core_type = #tpu.core_type<tc>, window_params = [{transform_indices = @transform_0, window_bounds = array<i64: 16, 64>}, {pipeline_mode = #tpu.pipeline_mode<synchronous>, transform_indices = @transform_1, window_bounds = array<i64: 192, 128>}, {pipeline_mode = #tpu.pipeline_mode<synchronous>, transform_indices = @transform_2, window_bounds = array<i64: 1, 128>}, {pipeline_mode = #tpu.pipeline_mode<synchronous>, transform_indices = @transform_3, window_bounds = array<i64: 384, 256>}, {pipeline_mode = #tpu.pipeline_mode<synchronous>, transform_indices = @transform_4, window_bounds = array<i64: 1, 256>}, {pipeline_mode = #tpu.pipeline_mode<synchronous>, transform_indices = @transform_5, window_bounds = array<i64: 1, 16>}, {pipeline_mode = #tpu.pipeline_mode<synchronous>, transform_indices = @transform_6, window_bounds = array<i64: 256, 128>}, {pipeline_mode = #tpu.pipeline_mode<synchronous>, transform_indices = @transform_7, window_bounds = array<i64: 1, 128>}, {transform_indices = @transform_8, window_bounds = array<i64: 1, 1, 128>}]} {
    %c0 = arith.constant 0 : index
    %c0_0 = arith.constant 0 : index
    %0 = vector.load %arg1[%c0, %c0_0] : memref<16x64xbf16, #tpu.memory_space<vmem>>, vector<16x64xbf16>
    %1 = arith.extf %0 : vector<16x64xbf16> to vector<16x64xf32>
    %2 = tpu.iota {dimensions = array<i32: 0>} : vector<16x1xi32>
    %c16_i32 = arith.constant 16 : i32
    %c0_i32 = arith.constant 0 : i32
    %3 = arith.cmpi eq, %c16_i32, %c0_i32 : i32
    %c1_i32 = arith.constant 1 : i32
    %4 = arith.select %3, %c1_i32, %c16_i32 : i32
    %5 = vector.broadcast %4 : i32 to vector<16x1xi32>
    %6 = arith.remsi %2, %5 : vector<16x1xi32>
    %c0_i32_1 = arith.constant 0 : i32
    %7 = vector.broadcast %c0_i32_1 : i32 to vector<16x1xi32>
    %8 = arith.cmpi ne, %6, %7 : vector<16x1xi32>
    %c0_i32_2 = arith.constant 0 : i32
    %9 = vector.broadcast %c0_i32_2 : i32 to vector<16x1xi32>
    %10 = arith.cmpi slt, %6, %9 : vector<16x1xi32>
    %c0_i32_3 = arith.constant 0 : i32
    %11 = arith.cmpi slt, %4, %c0_i32_3 : i32
    %12 = vector.broadcast %11 : i1 to vector<16x1xi1>
    %13 = vector.broadcast %12 : vector<16x1xi1> to vector<16x1xi1>
    %14 = arith.xori %10, %13 : vector<16x1xi1>
    %15 = arith.andi %14, %8 : vector<16x1xi1>
    %16 = vector.broadcast %4 : i32 to vector<16x1xi32>
    %17 = arith.addi %6, %16 : vector<16x1xi32>
    %18 = arith.select %15, %17, %6 : vector<16x1xi1>, vector<16x1xi32>
    %c0_i32_4 = arith.constant 0 : i32
    %19 = vector.broadcast %c0_i32_4 : i32 to vector<16x1xi32>
    %20 = arith.cmpi ne, %18, %19 : vector<16x1xi32>
    %c15_i32 = arith.constant 15 : i32
    %21 = vector.broadcast %c15_i32 : i32 to vector<16x1xi32>
    %22 = arith.cmpi ne, %18, %21 : vector<16x1xi32>
    %c1_i32_5 = arith.constant 1 : i32
    %23 = tpu.dynamic_rotate %1 by %c1_i32_5 dim 0 : vector<16x64xf32>, i32 -> vector<16x64xf32>
    %cst = arith.constant 0.000000e+00 : f32
    %24 = vector.shape_cast %20 : vector<16x1xi1> to vector<16x1xi1>
    %25 = vector.broadcast %24 : vector<16x1xi1> to vector<16x64xi1>
    %26 = vector.broadcast %cst : f32 to vector<16x64xf32>
    %27 = arith.select %25, %23, %26 : vector<16x64xi1>, vector<16x64xf32>
    %c15_i32_6 = arith.constant 15 : i32
    %28 = tpu.dynamic_rotate %1 by %c15_i32_6 dim 0 : vector<16x64xf32>, i32 -> vector<16x64xf32>
    %cst_7 = arith.constant 0.000000e+00 : f32
    %29 = vector.shape_cast %22 : vector<16x1xi1> to vector<16x1xi1>
    %30 = vector.broadcast %29 : vector<16x1xi1> to vector<16x64xi1>
    %31 = vector.broadcast %cst_7 : f32 to vector<16x64xf32>
    %32 = arith.select %30, %28, %31 : vector<16x64xi1>, vector<16x64xf32>
    %33 = tpu.concatenate %27, %1, %32 in 1 : vector<16x64xf32>, vector<16x64xf32>, vector<16x64xf32> -> vector<16x192xf32>
    %34 = arith.truncf %33 : vector<16x192xf32> to vector<16x192xbf16>
    %c0_8 = arith.constant 0 : index
    %c0_9 = arith.constant 0 : index
    %35 = vector.load %arg2[%c0_8, %c0_9] : memref<192x128xbf16, #tpu.memory_space<vmem>>, vector<192x128xbf16>
    %cst_10 = arith.constant dense<0.000000e+00> : vector<16x128xf32>
    %36 = tpu.matmul %34, %35, %cst_10 {dimension_numbers = #tpu.dot_dimension_numbers<[1], [0], [0], [1], [0, 0, 1, 1], [], []>} : vector<16x192xbf16>, vector<192x128xbf16>, vector<16x128xf32> -> vector<16x128xf32>
    %c0_11 = arith.constant 0 : index
    %c0_12 = arith.constant 0 : index
    %37 = vector.load %arg3[%c0_11, %c0_12] : memref<1x128xf32, #tpu.memory_space<vmem>>, vector<1x128xf32>
    %38 = vector.broadcast %37 : vector<1x128xf32> to vector<16x128xf32>
    %39 = arith.addf %36, %38 : vector<16x128xf32>
    %cst_13 = arith.constant 0.000000e+00 : f32
    %40 = vector.broadcast %cst_13 : f32 to vector<16x128xf32>
    %41 = arith.maximumf %39, %40 : vector<16x128xf32>
    %c1_i32_14 = arith.constant 1 : i32
    %42 = tpu.dynamic_rotate %41 by %c1_i32_14 dim 0 : vector<16x128xf32>, i32 -> vector<16x128xf32>
    %cst_15 = arith.constant 0.000000e+00 : f32
    %43 = vector.shape_cast %20 : vector<16x1xi1> to vector<16x1xi1>
    %44 = vector.broadcast %43 : vector<16x1xi1> to vector<16x128xi1>
    %45 = vector.broadcast %cst_15 : f32 to vector<16x128xf32>
    %46 = arith.select %44, %42, %45 : vector<16x128xi1>, vector<16x128xf32>
    %c15_i32_16 = arith.constant 15 : i32
    %47 = tpu.dynamic_rotate %41 by %c15_i32_16 dim 0 : vector<16x128xf32>, i32 -> vector<16x128xf32>
    %cst_17 = arith.constant 0.000000e+00 : f32
    %48 = vector.shape_cast %22 : vector<16x1xi1> to vector<16x1xi1>
    %49 = vector.broadcast %48 : vector<16x1xi1> to vector<16x128xi1>
    %50 = vector.broadcast %cst_17 : f32 to vector<16x128xf32>
    %51 = arith.select %49, %47, %50 : vector<16x128xi1>, vector<16x128xf32>
    %52 = tpu.concatenate %46, %41, %51 in 1 : vector<16x128xf32>, vector<16x128xf32>, vector<16x128xf32> -> vector<16x384xf32>
    %53 = arith.truncf %52 : vector<16x384xf32> to vector<16x384xbf16>
    %c0_18 = arith.constant 0 : index
    %c0_19 = arith.constant 0 : index
    %54 = vector.load %arg4[%c0_18, %c0_19] : memref<384x256xbf16, #tpu.memory_space<vmem>>, vector<384x256xbf16>
    %cst_20 = arith.constant dense<0.000000e+00> : vector<16x256xf32>
    %55 = tpu.matmul %53, %54, %cst_20 {dimension_numbers = #tpu.dot_dimension_numbers<[1], [0], [0], [1], [0, 0, 1, 1], [], []>} : vector<16x384xbf16>, vector<384x256xbf16>, vector<16x256xf32> -> vector<16x256xf32>
    %c0_21 = arith.constant 0 : index
    %c0_22 = arith.constant 0 : index
    %56 = vector.load %arg5[%c0_21, %c0_22] : memref<1x256xf32, #tpu.memory_space<vmem>>, vector<1x256xf32>
    %57 = vector.broadcast %56 : vector<1x256xf32> to vector<16x256xf32>
    %58 = arith.addf %55, %57 : vector<16x256xf32>
    %cst_23 = arith.constant 0.000000e+00 : f32
    %59 = vector.broadcast %cst_23 : f32 to vector<16x256xf32>
    %60 = arith.maximumf %58, %59 : vector<16x256xf32>
    %c0_24 = arith.constant 0 : index
    %c0_25 = arith.constant 0 : index
    %61 = vector.load %arg6[%c0_24, %c0_25] : memref<1x16xf32, #tpu.memory_space<vmem>>, vector<1x16xf32>
    %cst_26 = arith.constant dense<0.000000e+00> : vector<1x256xf32>
    %62 = tpu.matmul %61, %60, %cst_26 {dimension_numbers = #tpu.dot_dimension_numbers<[1], [0], [0], [1], [0, 0, 1, 1], [], []>} : vector<1x16xf32>, vector<16x256xf32>, vector<1x256xf32> -> vector<1x256xf32>
    %c0_27 = arith.constant 0 : index
    %c0_28 = arith.constant 0 : index
    %63 = vector.load %arg7[%c0_27, %c0_28] : memref<256x128xf32, #tpu.memory_space<vmem>>, vector<256x128xf32>
    %cst_29 = arith.constant dense<0.000000e+00> : vector<1x128xf32>
    %64 = tpu.matmul %62, %63, %cst_29 {dimension_numbers = #tpu.dot_dimension_numbers<[1], [0], [0], [1], [0, 0, 1, 1], [], []>} : vector<1x256xf32>, vector<256x128xf32>, vector<1x128xf32> -> vector<1x128xf32>
    %c0_30 = arith.constant 0 : index
    %c0_31 = arith.constant 0 : index
    %65 = vector.load %arg8[%c0_30, %c0_31] : memref<1x128xf32, #tpu.memory_space<vmem>>, vector<1x128xf32>
    %66 = arith.addf %64, %65 : vector<1x128xf32>
    %c0_32 = arith.constant 0 : index
    %c0_33 = arith.constant 0 : index
    %c0_34 = arith.constant 0 : index
    %67 = vector.load %arg9[%c0_32, %c0_33, %c0_34] : memref<1x1x128xf32, #tpu.memory_space<vmem>>, vector<1x1x128xf32>
    %68 = vector.shape_cast %67 : vector<1x1x128xf32> to vector<1x128xf32>
    %69 = vector.shape_cast %66 : vector<1x128xf32> to vector<1x1x128xf32>
    tpu.vector_store %arg9[%c0_32, %c0_33, %c0_34], %69 {strides = array<i32>} : memref<1x1x128xf32, #tpu.memory_space<vmem>>, vector<1x1x128xf32>,
    return
  }
  func.func @transform_0(%arg0: i32) -> (i32, i32) {
    %c0_i32 = arith.constant 0 : i32
    %c0_i32_0 = arith.constant 0 : i32
    return %arg0, %c0_i32 : i32, i32
  }
  func.func @transform_1(%arg0: i32) -> (i32, i32) {
    %c0_i32 = arith.constant 0 : i32
    %c0_i32_0 = arith.constant 0 : i32
    %c0_i32_1 = arith.constant 0 : i32
    return %c0_i32, %c0_i32_0 : i32, i32
  }
  func.func @transform_2(%arg0: i32) -> (i32, i32) {
    %c0_i32 = arith.constant 0 : i32
    %c0_i32_0 = arith.constant 0 : i32
    %c0_i32_1 = arith.constant 0 : i32
    return %c0_i32, %c0_i32_0 : i32, i32
  }
  func.func @transform_3(%arg0: i32) -> (i32, i32) {
    %c0_i32 = arith.constant 0 : i32
    %c0_i32_0 = arith.constant 0 : i32
    %c0_i32_1 = arith.constant 0 : i32
    return %c0_i32, %c0_i32_0 : i32, i32
  }
  func.func @transform_4(%arg0: i32) -> (i32, i32) {
    %c0_i32 = arith.constant 0 : i32
    %c0_i32_0 = arith.constant 0 : i32
    %c0_i32_1 = arith.constant 0 : i32
    return %c0_i32, %c0_i32_0 : i32, i32
  }
  func.func @transform_5(%arg0: i32) -> (i32, i32) {
    %c0_i32 = arith.constant 0 : i32
    %c0_i32_0 = arith.constant 0 : i32
    %c0_i32_1 = arith.constant 0 : i32
    return %c0_i32, %c0_i32_0 : i32, i32
  }
  func.func @transform_6(%arg0: i32) -> (i32, i32) {
    %c0_i32 = arith.constant 0 : i32
    %c0_i32_0 = arith.constant 0 : i32
    %c0_i32_1 = arith.constant 0 : i32
    return %c0_i32, %c0_i32_0 : i32, i32
  }
  func.func @transform_7(%arg0: i32) -> (i32, i32) {
    %c0_i32 = arith.constant 0 : i32
    %c0_i32_0 = arith.constant 0 : i32
    %c0_i32_1 = arith.constant 0 : i32
    return %c0_i32, %c0_i32_0 : i32, i32
  }
  func.func @transform_8(%arg0: i32) -> (i32, i32, i32) {
    %c0_i32 = arith.constant 0 : i32
    %c0_i32_0 = arith.constant 0 : i32
    %c0_i32_1 = arith.constant 0 : i32
    return %arg0, %c0_i32, %c0_i32_0 : i32, i32, i32
  }
}

</mosaic_0001>

<bundles_post_ra>
// kernel: hook_wrapper_forward.1
= control target key start
LH: loop header
LB: loop body
LE: loop exit
PB: predicated region body
PF: predicated region fallthrough
CT: control target
= control target key end

     0   :  { %13 = vsyncpa [#allocation3], 0  ;;  %s2036_s0 = inlined_call_operand.vmem [shape: bf16[32,64], index: 0, kind: input, shape index: {}]   ;;  %s2037_s1 = inlined_call_operand.vmem [shape: bf16[192,128], index: 1, kind: input, shape index: {}]   ;;  %s2038_s2 = inlined_call_operand.vmem [shape: f32[1,128], index: 2, kind: input, shape index: {}]   ;;  %s2039_s3 = inlined_call_operand.vmem [shape: bf16[384,256], index: 3, kind: input, shape index: {}]   ;;  %s2040_s4 = inlined_call_operand.vmem [shape: f32[1,256], index: 4, kind: input, shape index: {}]   ;;  %s2041_s5 = inlined_call_operand.vmem [shape: f32[1,16], index: 5, kind: input, shape index: {}]   ;;  %s2042_s6 = inlined_call_operand.vmem [shape: f32[256,128], index: 6, kind: input, shape index: {}]   ;;  %s2043_s7 = inlined_call_operand.vmem [shape: f32[1,128], index: 7, kind: input, shape index: {}]   ;;  %s2044_s8 = inlined_call_operand.hbm [shape: f32[2,1,128], index: 8, kind: output, shape index: {}]  }
   0x1   :  { %15 = vsyncpa [#allocation3 + $0x1], 0  ;;  %s1585_s27 = smov 0   ;;  %s1587_s28 = smov 0  }
   0x2   :  { %s1589_s29 = smov 0   ;;  %s1591_s30 = smov 0  }
   0x3 LB: > { %s1606_s9 = sadd.s32 4294967295, %s1533_s30   ;;  %s1178_s10 = sadd.s32 4294967294, %s1533_s30   ;;  %s1533_s30 = sphi %s1591_s30, %s2054_s30   ;;  %s1529_s29 = sphi %s1589_s29, %s2053_s29   ;;  %s1525_s28 = sphi %s1587_s28, %s2052_s28   ;;  %s1521_s27 = sphi %s1585_s27, %s2051_s27  }
   0x4   : > { %s1610_s11 = sadd.s32 1, %s1533_s30   ;;  %s201_s12 = sadd.s32 1, %s1529_s29 }
   0x5   : > { %s198_s13 = ssub.s32 %s1533_s30, %s1610_s11  ;;  %p211_p0 = scmp.ne.s32.totalorder %s1529_s29, %s1525_s28 }
   0x6   : > { %p199_p1 = scmp.eq.s32.totalorder %s198_s13, 0  ;;  %p212_p2 = scmp.eq.s32.totalorder %s1606_s9, 1 }
   0x7   : > { %p217_p3 = scmp.ne.s32.totalorder %s1525_s28, %s1521_s27  ;;  %p218_p4 = scmp.eq.s32.totalorder %s1178_s10, 1 }
   0x8   : > { %s1621_s14 = scalar_select %p199_p1, %s1529_s29, %s201_s12  }
   0x9   : > { %p1623_p5 = por %p212_p2, %p211_p0  ;;  %p1627_p6 = por %p218_p4, %p217_p3 }
   0xa   : > { %p1181_p7 = scmp.ge.s32.totalorder %s1533_s30, 1  ;;  %p266_p8 = scmp.lt.s32.totalorder %s1533_s30, 3 }
   0xc   : > { %p267_p9 = pnand %p1181_p7, %p266_p8 }
   0xd   : > { %s1182_s17 = sshll.u32 (!%p267_p9), %s1606_s9, 1  ;;  %v1387_v0 = vld [vmem:[%s2037_s1] sm:$0xff] (!%p267_p9)   ;;  %v310_v1 = vlaneseq (!%p267_p9)  ;;  %v1535_v2 = vmov (!%p267_p9), 0   ;;  %v1388_v3 = vld [vmem:[%s2037_s1 + $0x8] sm:$0xff] (!%p267_p9)   ;;  %v1389_v5 = vld [vmem:[%s2037_s1 + $0x10] sm:$0xff] (!%p267_p9)   ;;  %vm371_vm3 = vcmask (!%p267_p9), 523264  }
   0xe   : > { %270 = sbr.rel (%p267_p9) target bundleno = 1074 (0x432), region = 52  ;;  %p300_p10 = scmp.lt.s32.totalorder (!%p267_p9), %s1182_s17, 3  ;;  %482 = vmatprep.subr.bf16.mxu0 (!%p267_p9), %v1535_v2  ;;  %v1390_v14 = vld [vmem:[%s2037_s1 + $0x18] sm:$0xff] (!%p267_p9)   ;;  %v1391_v18 = vld [vmem:[%s2037_s1 + $0x20] sm:$0xff] (!%p267_p9)   ;;  %v1392_v29 = vld [vmem:[%s2037_s1 + $0x28] sm:$0xff] (!%p267_p9)   ;;  %vm1537_vm5 = vmmov (!%p267_p9), 1  }
   0xf   : > { %483 = vmatpush1.bf16.msra.mxu0 (!%p267_p9), %v1387_v0  ;;  %v1642_v4 = vshrl.u32 (!%p267_p9), %v310_v1, 7  ;;  %v1399_v21 = vld [vmem:[%s2039_s3 + $0x4] ss:$8 sps:$4 sm:$0xff] (!%p267_p9)   ;;  %v1401_v22 = vld [vmem:[%s2039_s3] ss:$8 sps:$4 sm:$0xff] (!%p267_p9)   ;;  %v1393_v32 = vld [vmem:[%s2037_s1 + $0x30] sm:$0xff] (!%p267_p9)  }
  0x10   : > { %484 = vmatprep.subr.bf16.mxu0 (!%p267_p9), %v1535_v2  ;;  %v1402_v25 = vld [vmem:[%s2039_s3 + $0x14] ss:$8 sps:$4 sm:$0xff] (!%p267_p9)   ;;  %840 = vmatprep.subr.bf16.mxu1 (!%p267_p9), %v1399_v21  ;;  %v1404_v28 = vld [vmem:[%s2039_s3 + $0x10] ss:$8 sps:$4 sm:$0xff] (!%p267_p9)   ;;  %v1405_v30 = vld [vmem:[%s2039_s3 + $0x24] ss:$8 sps:$4 sm:$0xff] (!%p267_p9)  }
  0x11   : > { %v312_v6 = vadd.s32 (!%p267_p9), 8, %v1642_v4  ;;  %vm343_vm0 = vcmp.lt.s32.totalorder (!%p267_p9), %v1642_v4, 1  ;;  %vm354_vm2 = vcmp.lt.s32.totalorder (!%p267_p9), %v1642_v4, 7  ;;  %841 = vmatpush1.bf16.msra.mxu1 (!%p267_p9), %v1401_v22  ;;  %v1407_v31 = vld [vmem:[%s2039_s3 + $0x20] ss:$8 sps:$4 sm:$0xff] (!%p267_p9)   ;;  %v1394_v35 = vld [vmem:[%s2037_s1 + $0x38] sm:$0xff] (!%p267_p9)  }
  0x12   : > { %842 = vmatprep.subr.bf16.mxu1 (!%p267_p9), %v1402_v25  ;;  %v1408_v33 = vld [vmem:[%s2039_s3 + $0x34] ss:$8 sps:$4 sm:$0xff] (!%p267_p9)   ;;  %v1410_v34 = vld [vmem:[%s2039_s3 + $0x30] ss:$8 sps:$4 sm:$0xff] (!%p267_p9)   ;;  %v1411_v36 = vld [vmem:[%s2039_s3 + $0x44] ss:$8 sps:$4 sm:$0xff] (!%p267_p9)  }
  0x13   : > { %485 = vmatpush1.bf16.msra.mxu0 (!%p267_p9), %v1388_v3  ;;  %v324_v10 = vand.u32 (!%p267_p9), 15, %v312_v6  ;;  %v1413_v37 = vld [vmem:[%s2039_s3 + $0x40] ss:$8 sps:$4 sm:$0xff] (!%p267_p9)   ;;  %v1414_v39 = vld [vmem:[%s2039_s3 + $0x54] ss:$8 sps:$4 sm:$0xff] (!%p267_p9)   ;;  %v317_v59 = vand.u32 (!%p267_p9), 15, %v1642_v4 }
  0x14   : > { %486 = vmatprep.subr.bf16.mxu0 (!%p267_p9), %v1535_v2  ;;  %v1395_v38 = vld [vmem:[%s2037_s1 + $0x40] sm:$0xff] (!%p267_p9)   ;;  %v1416_v40 = vld [vmem:[%s2039_s3 + $0x50] ss:$8 sps:$4 sm:$0xff] (!%p267_p9)   ;;  %v1396_v41 = vld [vmem:[%s2037_s1 + $0x48] sm:$0xff] (!%p267_p9)   ;;  %vm931_vm8 = vcmask (!%p267_p9), 130048   ;;  %s297_s18 = sand.u32 (!%p267_p9), 1, %s1525_s28  }
  0x15   : > { %s2056_s17 = smov (!%p300_p10, %s1182_s17), 3  ;;  %vm1668_vm1 = vcmp.ne.s32.totalorder %v324_v10, 15  ;;  %843 = vmatpush1.bf16.msra.mxu1 %v1404_v28  ;;  %v1417_v42 = vld [vmem:[%s2039_s3 + $0x64] ss:$8 sps:$4 sm:$0xff]   ;;  %v1419_v43 = vld [vmem:[%s2039_s3 + $0x60] ss:$8 sps:$4 sm:$0xff]  }
  0x16   : > { %s1183_s22 = sshll.u32 %s2056_s17, 2  ;;  %s1536_s17 = smov 64   ;;  %844 = vmatprep.subr.bf16.mxu1 %v1405_v30  ;;  %v1397_v44 = vld [vmem:[%s2037_s1 + $0x50] sm:$0xff]   ;;  %v1398_v47 = vld [vmem:[%s2037_s1 + $0x58] sm:$0xff]   ;;  %v1423_v48 = vld [vmem:[%s2039_s3 + $0x84] ss:$8 sps:$4 sm:$0xff]  }
  0x17   : > { %s303_s25 = scalar_lea.vmem %s2036_s0, %s1183_s22  ;;  %487 = vmatpush1.bf16.msra.mxu0 %v1389_v5  ;;  %v1420_v45 = vld [vmem:[%s2039_s3 + $0x74] ss:$8 sps:$4 sm:$0xff]   ;;  %v1422_v46 = vld [vmem:[%s2039_s3 + $0x70] ss:$8 sps:$4 sm:$0xff]   ;;  %v1425_v49 = vld [vmem:[%s2039_s3 + $0x80] ss:$8 sps:$4 sm:$0xff]  }
  0x18   : > { %v1257_v7 = vld [vmem:[%s303_s25] sm:$0xff]   ;;  %488 = vmatprep.subr.bf16.mxu0 %v1535_v2  ;;  %v1426_v50 = vld [vmem:[%s2039_s3 + $0x94] ss:$8 sps:$4 sm:$0xff]   ;;  %v1428_v51 = vld [vmem:[%s2039_s3 + $0x90] ss:$8 sps:$4 sm:$0xff]   ;;  %vm1791_vm4 = vcmp.ne.s32.totalorder %v317_v59, 0 }
  0x19   : > { %v1258_v8 = vunpack.c.l.bf16 %v1257_v7  ;;  %v1259_v9 = vunpack.c.h.bf16 %v1257_v7  ;;  %845 = vmatpush1.bf16.msra.mxu1 %v1407_v31  ;;  %v1429_v52 = vld [vmem:[%s2039_s3 + $0xa4] ss:$8 sps:$4 sm:$0xff]   ;;  %v1431_v53 = vld [vmem:[%s2039_s3 + $0xa0] ss:$8 sps:$4 sm:$0xff]   ;;  %v1432_v54 = vld [vmem:[%s2039_s3 + $0xb4] ss:$8 sps:$4 sm:$0xff]  }
  0x1a   : > { %846 = vmatprep.subr.bf16.mxu1 %v1408_v33  ;;  %v1434_v55 = vld [vmem:[%s2039_s3 + $0xb0] ss:$8 sps:$4 sm:$0xff]   ;;  %v1435_v56 = vld [vmem:[%s2039_s3 + $0xc4] ss:$8 sps:$4 sm:$0xff]   ;;  %v1437_v57 = vld [vmem:[%s2039_s3 + $0xc0] ss:$8 sps:$4 sm:$0xff]  }
  0x1b   : > { %v342_v11 = vrot.slane %v1259_v9, 7  ;;  %v1382_v12 = vpack.i.bf16 %v1259_v9, %v1258_v8  ;;  %v341_v13 = vrot.slane %v1258_v8, 7  ;;  %v352_v17 = vrot.slane %v1258_v8, 1  ;;  %489 = vmatpush1.bf16.msra.mxu0 %v1390_v14  ;;  %v1438_v58 = vld [vmem:[%s2039_s3 + $0xd4] ss:$8 sps:$4 sm:$0xff]   ;;  %vm1246_vm6 = vmpackc.low %vm1537_vm5, %vm1791_vm4  ;;  %s1253_s21 = sshll.u32 %s1606_s9, 4 }
  0x1c   : > { %v353_v20 = vrot.slane %v1259_v9, 1  ;;  %490 = vmatprep.subr.bf16.mxu0 %v1535_v2  ;;  %v1440_v6 = vld [vmem:[%s2039_s3 + $0xd0] ss:$8 sps:$4 sm:$0xff]   ;;  %v1441_v7 = vld [vmem:[%s2039_s3 + $0xe4] ss:$8 sps:$4 sm:$0xff]   ;;  %vm1249_vm7 = vmpackc.low %vm1668_vm1, %vm1537_vm5  ;;  %s298_s22 = scalar_lea.vmem [#allocation2], %s297_s18  ;;  %s1994_s26 = scalar_lea.hbm %s2044_s8, %s1253_s21 }
  0x1d   : > { %1383 = vrot.lane.b32.xlu0 %v1382_v12, %s1536_s17  ;;  %v1659_v15 = vsel %vm343_vm0, %v341_v13, %v342_v11  ;;  %v1663_v16 = vsel %vm343_vm0, %v342_v11, %v341_v13  ;;  %847 = vmatpush1.bf16.msra.mxu1 %v1410_v34  ;;  %v1443_v8 = vld [vmem:[%s2039_s3 + $0xe0] ss:$8 sps:$4 sm:$0xff]   ;;  %v1444_v9 = vld [vmem:[%s2039_s3 + $0xf4] ss:$8 sps:$4 sm:$0xff]   ;;  %v1446_v10 = vld [vmem:[%s2039_s3 + $0xf0] ss:$8 sps:$4 sm:$0xff]  }
  0x1e   : > { %v355_v23 = vsel %vm354_vm2, %v352_v17, %v353_v20  ;;  %v356_v24 = vsel %vm354_vm2, %v353_v20, %v352_v17  ;;  %848 = vmatprep.subr.bf16.mxu1 %v1411_v36  ;;  %v350_v62 = vsel %vm1791_vm4, %v1663_v16, 0.0  ;;  %v1449_v11 = vld [vmem:[%s2039_s3 + $0x104] ss:$8 sps:$4 sm:$0xff]   ;;  %v1184_v12 = vld [vmem:[%s2038_s2] ss:$0 sm:$0xff]  ;;  %s1123_s23 = sshll.u32 %s298_s22, 4  ;;  %s1996_s23 = int_to_ptr.vmem [resolvable:$true] %s1123_s23 }
  0x1f   : > { %v362_v26 = vsel %vm1668_vm1, %v356_v24, 0.0  ;;  %491 = vmatpush1.bf16.msra.mxu0 %v1391_v18  ;;  %v1452_v34 = vld [vmem:[%s2039_s3 + $0x114] ss:$8 sps:$4 sm:$0xff]   ;;  %v1455_v36 = vld [vmem:[%s2039_s3 + $0x124] ss:$8 sps:$4 sm:$0xff]   ;;  %s1111_s10 = scalar_lea.sflag [#allocation3], %s297_s18 }
  0x20   : > { %v375_v27 = vpack.c.bf16 %v362_v26, %v355_v23  ;;  %492 = vmatprep.subr.bf16.mxu0 %v1535_v2  ;;  %s1471_s12 = scalar_lea.vmem %s1996_s23, 16  ;;  %s1539_s9 = smov [#allocation2]  }
  0x21   : > { %849 = vmatpush1.bf16.msra.mxu1 %v1413_v37  ;;  %v1453_v37 = vld [vmem:[%s2039_s3 + $0x120] ss:$8 sps:$4 sm:$0xff]   ;;  %p1472_p11 = scmp.ne.s32.totalorder %s1996_s23, %s1471_s12  ;;  %s1475_s13 = sshll.u32 %s1539_s9, 4  ;;  %s1476_s13 = int_to_ptr.vmem [resolvable:$false] %s1475_s13 }
  0x22   : > { %1197 = vmatprep.mubr.msk.bf16.mxu0 %vm371_vm3, %v375_v27  ;;  %850 = vmatprep.subr.bf16.mxu1 %v1414_v39  ;;  %v1461_v39 = vld [vmem:[%s2039_s3 + $0x144] ss:$8 sps:$4 sm:$0xff]   ;;  %s1477_s17 = scalar_lea.vmem %s1476_s13, 32  ;;  %p1478_p0 = scmp.lt.s32.totalorder %s1996_s23, %s1476_s13 }
  0x23   : > { %493 = vmatpush1.bf16.msra.mxu0 %v1392_v29  ;;  %v1447_v29 = vld [vmem:[%s2039_s3 + $0x100] ss:$8 sps:$4 sm:$0xff]   ;;  %p1473_p12 = pnand %p1472_p11, %p1623_p5  ;;  %p1479_p1 = scmp.lt.s32.totalorder %s1477_s17, %s1471_s12 }
  0x24   : > { %494 = vmatprep.subr.bf16.mxu0 %v1535_v2 }
  0x25   : > { %851 = vmatpush1.bf16.msra.mxu1 %v1416_v40  ;;  %v1459_v40 = vld [vmem:[%s2039_s3 + $0x140] ss:$8 sps:$4 sm:$0xff]   ;;  %p1474_p13 = pneg %p1473_p12  ;;  %p1480_p2 = por %p1479_p1, %p1478_p0 }
  0x26   : > { %852 = vmatprep.subr.bf16.mxu1 %v1417_v42  ;;  %v1462_v42 = vld [vmem:[%s2039_s3 + $0x150] ss:$8 sps:$4 sm:$0xff]  }
  0x27   : > { %495 = vmatpush1.bf16.msra.mxu0 %v1393_v32  ;;  %p1481_p3 = pnand %p1480_p2, %p1474_p13 }
  0x28   : > { %496 = vmatprep.subr.bf16.mxu0 %v1535_v2 }
  0x29   : > { %853 = vmatpush1.bf16.msra.mxu1 %v1419_v43  ;;  %v1467_v43 = vld [vmem:[%s2039_s3 + $0x164] ss:$8 sps:$4 sm:$0xff]  }
  0x2a   : > { %854 = vmatprep.subr.bf16.mxu1 %v1420_v45  ;;  %v1470_v45 = vld [vmem:[%s2039_s3 + $0x174] ss:$8 sps:$4 sm:$0xff]  }
  0x2b   : > { %497 = vmatpush1.bf16.msra.mxu0 %v1394_v35  ;;  %v1450_v35 = vld [vmem:[%s2039_s3 + $0x110] ss:$8 sps:$4 sm:$0xff]  }
  0x2c   : > { %498 = vmatprep.subr.bf16.mxu0 %v1535_v2 }
  0x2d   : > { %855 = vmatpush1.bf16.msra.mxu1 %v1422_v46  ;;  %v1468_v46 = vld [vmem:[%s2039_s3 + $0x170] ss:$8 sps:$4 sm:$0xff]  }
  0x2e   : > { %856 = vmatprep.subr.bf16.mxu1 %v1423_v48  ;;  %v592_v48 = vsub.s32 0, %v1642_v4 }
  0x2f   : > { %499 = vmatpush1.bf16.msra.mxu0 %v1395_v38  ;;  %v1458_v38 = vld [vmem:[%s2039_s3 + $0x134] ss:$8 sps:$4 sm:$0xff]  }
  0x30   : > { %500 = vmatprep.subr.bf16.mxu0 %v1535_v2 }
  0x31   : > { %857 = vmatpush1.bf16.msra.mxu1 %v1425_v49  ;;  %v588_v49 = vld [vmem:[%s2040_s4] sm:$0x3] }
  0x32   : > { %858 = vmatprep.subr.bf16.mxu1 %v1426_v50  ;;  %v596_v50 = vsub.s32 1, %v1642_v4  ;;  %v1023_v4 = vld [vmem:[%s2042_s6 + $0x88] sm:$0xff] }
  0x33   : > { %501 = vmatpush1.bf16.msra.mxu0 %v1396_v41  ;;  %v1464_v41 = vld [vmem:[%s2039_s3 + $0x154] ss:$8 sps:$4 sm:$0xff]  }
  0x34   : > { %502 = vmatprep.subr.bf16.mxu0 %v1535_v2 }
  0x35   : > { %859 = vmatpush1.bf16.msra.mxu1 %v1428_v51  ;;  %v593_v51 = vrot.slane %v588_v49, %v592_v48 }
  0x36   : > { %860 = vmatprep.subr.bf16.mxu1 %v1429_v52  ;;  %v597_v52 = vrot.slane %v588_v49, %v596_v50  ;;  %v1020_v49 = vld [vmem:[%s2042_s6 + $0x70] sm:$0xff]  ;;  %v1021_v50 = vld [vmem:[%s2042_s6 + $0x78] sm:$0xff] }
  0x37   : > { %503 = vmatpush1.bf16.msra.mxu0 %v1397_v44  ;;  %v1465_v44 = vld [vmem:[%s2039_s3 + $0x160] ss:$8 sps:$4 sm:$0xff]  }
  0x38   : > { %504 = vmatprep.subr.bf16.mxu0 %v1535_v2 }
  0x39   : > { %861 = vmatpush1.bf16.msra.mxu1 %v1431_v53 }
  0x3a   : > { %862 = vmatprep.subr.bf16.mxu1 %v1432_v54 }
  0x3b   : > { %505 = vmatpush1.bf16.msra.mxu0 %v1398_v47  ;;  %v1538_v47 = vmov 0.0  }
  0x3d   : > { %863 = vmatpush1.bf16.msra.mxu1 %v1434_v55 }
  0x3e   : > { %864 = vmatprep.subr.bf16.mxu1 %v1435_v56 }
  0x41   : > { %865 = vmatpush1.bf16.msra.mxu1 %v1437_v57 }
  0x42   : > { %866 = vmatprep.subr.bf16.mxu1 %v1438_v58 }
  0x45   : > { %867 = vmatpush1.bf16.msra.mxu1 %v1440_v6  ;;  %v1006_v6 = vld [vmem:[%s2042_s6] sm:$0xff] }
  0x46   : > { %868 = vmatprep.subr.bf16.mxu1 %v1441_v7  ;;  %v1007_v7 = vld [vmem:[%s2042_s6 + $0x8] sm:$0xff] }
  0x49   : > { %869 = vmatpush1.bf16.msra.mxu1 %v1443_v8  ;;  %v1024_v8 = vld [vmem:[%s2042_s6 + $0x90] sm:$0xff] }
  0x4a   : > { %870 = vmatprep.subr.bf16.mxu1 %v1444_v9  ;;  %v1025_v9 = vld [vmem:[%s2042_s6 + $0x98] sm:$0xff] }
  0x4d   : > { %871 = vmatpush1.bf16.msra.mxu1 %v1446_v10  ;;  %v930_v10 = vld [vmem:[%s2041_s5] sm:$0x1] }
  0x4e   : > { %883 = vmatprep.subr.bf16.mxu1 %v1449_v11  ;;  %v1301_v11 = vpack.c.bf16 %v1007_v7, %v1006_v6 }
  0x8f   : > { %v1384_v61 = vpop.permute.xlu0 %1383 }
  0x90   : > { %v1386_v63 = vunpack.i.h.bf16 %v1384_v61  ;;  %v1385_v0 = vunpack.i.l.bf16 %v1384_v61 }
  0x92   : > { %v372_v1 = vsel %vm371_vm3, %v350_v62, %v1385_v0  ;;  %v373_v3 = vsel %vm371_vm3, %v1659_v15, %v1386_v63  ;;  %v1022_v62 = vld [vmem:[%s2042_s6 + $0x80] sm:$0xff] }
  0x93   : > { %v374_v5 = vpack.c.bf16 %v373_v3, %v372_v1 }
  0x95   : > { %515 = vmatmul.mubr.bf16.vlgmr.msra.gmra.mrb[0].mxu0 %v374_v5  ;;  %v1299_v5 = vpack.c.bf16 %v1023_v4, %v1022_v62 }
  0x96   : > { %999 = vmatprep.mubr.f32.mxu0 %v1538_v47 }
 0x168   : > { %v516_v13 = vpop.f32.mrb[0].mxu0 }
 0x169   : > { %v517_v14 = vadd.f32 %v1184_v12, %v516_v13  ;;  %v518_v15 = vpop.f32.mrb[1].mxu0  ;;  %v1008_v13 = vld [vmem:[%s2042_s6 + $0x10] sm:$0xff] }
 0x16a   : > { %v519_v16 = vpop.f32.mrb[2].mxu0  ;;  %v1026_v15 = vld [vmem:[%s2042_s6 + $0xa0] sm:$0xff] }
 0x16b   : > { %v523_v17 = vmax.f32 %v517_v14, 0.0  ;;  %v520_v18 = vadd.f32 %v1184_v12, %v519_v16  ;;  %v521_v20 = vpop.f32.mrb[3].mxu0  ;;  %v1303_v12 = vpack.c.bf16 %v1025_v9, %v1024_v8  ;;  %v1009_v14 = vld [vmem:[%s2042_s6 + $0x18] sm:$0xff]  ;;  %v1027_v16 = vld [vmem:[%s2042_s6 + $0xa8] sm:$0xff] }
 0x16c   : > { %v1010_v20 = vld [vmem:[%s2042_s6 + $0x20] sm:$0xff] }
 0x16d   : > { %v524_v21 = vmax.f32 %v520_v18, 0.0  ;;  %v525_v22 = vrot.slane %v523_v17, 7  ;;  %v531_v23 = vrot.slane %v523_v17, 1  ;;  %v1307_v18 = vpack.c.bf16 %v1027_v16, %v1026_v15 }
 0x16f   : > { %v526_v24 = vrot.slane %v524_v21, 7  ;;  %v532_v25 = vrot.slane %v524_v21, 1  ;;  %v538_v26 = vpack.c.bf16 %v524_v21, %v523_v17  ;;  %v1305_v17 = vpack.c.bf16 %v1009_v14, %v1008_v13  ;;  %v1011_v21 = vld [vmem:[%s2042_s6 + $0x28] sm:$0xff] }
 0x171   : > { %v533_v27 = vsel %vm354_vm2, %v531_v23, %v532_v25  ;;  %v534_v28 = vsel %vm354_vm2, %v532_v25, %v531_v23  ;;  %872 = vmatprep.mubr.bf16.mxu1 %v538_v26  ;;  %v527_v30 = vsel %vm343_vm0, %v525_v22, %v526_v24  ;;  %v528_v31 = vsel %vm343_vm0, %v526_v24, %v525_v22  ;;  %v1028_v22 = vld [vmem:[%s2042_s6 + $0xb0] sm:$0xff]  ;;  %v1029_v23 = vld [vmem:[%s2042_s6 + $0xb8] sm:$0xff] }
 0x172   : > { %v1250_v32 = vpack.c.bf16 %v534_v28, %v533_v27  ;;  %v1247_v33 = vpack.c.bf16 %v527_v30, %v528_v31  ;;  %v1309_v24 = vpack.c.bf16 %v1011_v21, %v1010_v20  ;;  %v1311_v25 = vpack.c.bf16 %v1029_v23, %v1028_v22  ;;  %v1012_v26 = vld [vmem:[%s2042_s6 + $0x30] sm:$0xff]  ;;  %v1013_v27 = vld [vmem:[%s2042_s6 + $0x38] sm:$0xff]  ;;  %v1030_v28 = vld [vmem:[%s2042_s6 + $0xc0] sm:$0xff] }
 0x173   : > { %v1313_v30 = vpack.c.bf16 %v1013_v27, %v1012_v26 }
 0x174   : > { %1248 = vmatmul.mubr.msk.bf16.vlgmr.msra.gmra.mrb[0].mxu1 %vm1246_vm6, %v1247_v33  ;;  %v1015_v33 = vld [vmem:[%s2042_s6 + $0x48] sm:$0xff] }
 0x175   : > { %884 = vmatpush1.bf16.msra.mxu1 %v1447_v29  ;;  %915 = vmatprep.mubr.bf16.mxu1 %v1535_v2  ;;  %v1456_v2 = vld [vmem:[%s2039_s3 + $0x130] ss:$8 sps:$4 sm:$0xff]   ;;  %v1031_v29 = vld [vmem:[%s2042_s6 + $0xc8] sm:$0xff] }
 0x176   : > { %885 = vmatprep.subr.bf16.mxu1 %v1452_v34  ;;  %v1315_v31 = vpack.c.bf16 %v1031_v29, %v1030_v28  ;;  %v1032_v34 = vld [vmem:[%s2042_s6 + $0xd0] sm:$0xff] }
 0x179   : > { %886 = vmatpush1.bf16.msra.mxu1 %v1450_v35  ;;  %v1033_v35 = vld [vmem:[%s2042_s6 + $0xd8] sm:$0xff] }
 0x17a   : > { %887 = vmatprep.subr.bf16.mxu1 %v1455_v36 }
 0x17d   : > { %888 = vmatpush1.bf16.msra.mxu1 %v1453_v37  ;;  %v1319_v37 = vpack.c.bf16 %v1033_v35, %v1032_v34 }
 0x17e   : > { %889 = vmatprep.subr.bf16.mxu1 %v1458_v38  ;;  %v1016_v38 = vld [vmem:[%s2042_s6 + $0x50] sm:$0xff] }
 0x181   : > { %890 = vmatpush1.bf16.msra.mxu1 %v1456_v2  ;;  %v1017_v2 = vld [vmem:[%s2042_s6 + $0x58] sm:$0xff] }
 0x182   : > { %891 = vmatprep.subr.bf16.mxu1 %v1461_v39  ;;  %v1034_v39 = vld [vmem:[%s2042_s6 + $0xe0] sm:$0xff] }
 0x185   : > { %892 = vmatpush1.bf16.msra.mxu1 %v1459_v40  ;;  %v1035_v40 = vld [vmem:[%s2042_s6 + $0xe8] sm:$0xff] }
 0x186   : > { %893 = vmatprep.subr.bf16.mxu1 %v1464_v41  ;;  %v1321_v41 = vpack.c.bf16 %v1017_v2, %v1016_v38 }
 0x189   : > { %894 = vmatpush1.bf16.msra.mxu1 %v1462_v42  ;;  %v1323_v42 = vpack.c.bf16 %v1035_v40, %v1034_v39 }
 0x18a   : > { %895 = vmatprep.subr.bf16.mxu1 %v1467_v43  ;;  %v1018_v43 = vld [vmem:[%s2042_s6 + $0x60] sm:$0xff] }
 0x18d   : > { %896 = vmatpush1.bf16.msra.mxu1 %v1465_v44  ;;  %v1019_v44 = vld [vmem:[%s2042_s6 + $0x68] sm:$0xff] }
 0x18e   : > { %897 = vmatprep.subr.bf16.mxu1 %v1470_v45  ;;  %v1036_v45 = vld [vmem:[%s2042_s6 + $0xf0] sm:$0xff]  ;;  %v1325_v47 = vpack.c.bf16 %v1019_v44, %v1018_v43 }
 0x191   : > { %898 = vmatpush1.bf16.msra.mxu1 %v1468_v46  ;;  %v1037_v46 = vld [vmem:[%s2042_s6 + $0xf8] sm:$0xff] }
 0x192   : > { %v1327_v48 = vpack.c.bf16 %v1037_v46, %v1036_v45 }
 0x194   : > { %1251 = vmatmul.mubr.msk.bf16.vlgmr.msra.gmra.mrb[0].mxu1 %vm1249_vm7, %v1250_v32  ;;  %v1014_v32 = vld [vmem:[%s2042_s6 + $0x40] sm:$0xff] }
 0x195   : > { %v1317_v36 = vpack.c.bf16 %v1015_v33, %v1014_v32 }
 0x267   : > { %v917_v53 = vpop.f32.mrb[0].mxu1 }
 0x268   : > { %v1331_v54 = vadd.f32 %v917_v53, %v593_v51  ;;  %v919_v55 = vpop.f32.mrb[1].mxu1 }
 0x269   : > { %v1332_v56 = vadd.f32 %v919_v55, %v597_v52  ;;  %v921_v19 = vpop.f32.mrb[2].mxu1  ;;  %v1038_v55 = vld [vmem:[%s2043_s7] sm:$0x1] }
 0x26a   : > { %v1333_v57 = vadd.f32 %v921_v19, %v593_v51  ;;  %v923_v58 = vpop.f32.mrb[3].mxu1  ;;  %v926_v60 = vmax.f32 %v1331_v54, 0.0  ;;  %v1329_v51 = vpack.c.bf16 %v1021_v50, %v1020_v49 }
 0x26b   : > { %v1334_v59 = vadd.f32 %v923_v58, %v597_v52  ;;  %v927_v63 = vmax.f32 %v1332_v56, 0.0 }
 0x26c   : > { %v928_v61 = vmax.f32 %v1333_v57, 0.0 }
 0x26d   : > { %v929_v0 = vmax.f32 %v1334_v59, 0.0 }
 0x26e   : > { %v1297_v1 = vpack.c.bf16 %v928_v61, %v926_v60 }
 0x26f   : > { %v1295_v3 = vpack.c.bf16 %v929_v0, %v927_v63 }
 0x271   : > { %1296 = vmatprep.subr.bf16.mxu0 %v1295_v3 }
 0x272   : > { %1298 = vmatpush1.bf16.msra.mxu0 %v1297_v1 }
 0x273   : > { %1300 = vmatprep.subr.bf16.mxu0 %v1299_v5 }
 0x275   : > { %1252 = vmatmul.mubr.msk.f32.vlgmr.msra.gmra.mrb[4].mxu0 %vm931_vm8, %v930_v10 }
 0x276   : > { %1302 = vmatpush3.bf16.msra.mxu0 %v1301_v11 }
 0x277   : > { %1304 = vmatprep.subr.bf16.mxu0 %v1303_v12 }
 0x27a   : > { %1306 = vmatpush3.bf16.msra.mxu0 %v1305_v17 }
 0x27b   : > { %1308 = vmatprep.subr.bf16.mxu0 %v1307_v18 }
 0x27e   : > { %1310 = vmatpush3.bf16.msra.mxu0 %v1309_v24 }
 0x27f   : > { %1312 = vmatprep.subr.bf16.mxu0 %v1311_v25 }
 0x282   : > { %1314 = vmatpush3.bf16.msra.mxu0 %v1313_v30 }
 0x283   : > { %1316 = vmatprep.subr.bf16.mxu0 %v1315_v31 }
 0x286   : > { %1318 = vmatpush3.bf16.msra.mxu0 %v1317_v36 }
 0x287   : > { %1320 = vmatprep.subr.bf16.mxu0 %v1319_v37 }
 0x28a   : > { %1322 = vmatpush3.bf16.msra.mxu0 %v1321_v41 }
 0x28b   : > { %1324 = vmatprep.subr.bf16.mxu0 %v1323_v42 }
 0x28e   : > { %1326 = vmatpush3.bf16.msra.mxu0 %v1325_v47 }
 0x28f   : > { %1328 = vmatprep.subr.bf16.mxu0 %v1327_v48 }
 0x292   : > { %1330 = vmatpush3.bf16.msra.mxu0 %v1329_v51 }
 0x348   : > { %v1001_v52 = vpop.f32.mrb[4].mxu0 }
 0x349   : > { %v1003_v53 = vpop.f32.mrb[5].mxu0 }
 0x34a   : > { %1103 = vmatprep.mubr.f32.mxu0 %v1003_v53 }
 0x34b   : > { %1104 = vmatmul.mubr.f32.vlgmr.msra.gmra.mrb[6].mxu0 %v1001_v52 }
 0x41e   : > { %v1292_v54 = vpop.f32.mrb[6].mxu0 }
 0x41f   : > { %v1293_v56 = vpop.f32.mrb[7].mxu0 }
 0x420   : > { %v1294_v19 = vadd.f32 %v1293_v56, %v1292_v54 }
 0x422   : > { %v1106_v57 = vadd.f32 %v1294_v19, %v1038_v55 }
 0x424   : > { %1109 = vst [vmem:[%s298_s22] sm:$0x1] %v1106_v57 }
 0x425   : > { %1484 = shalt.err (!%p1481_p3)
}
 0x426   : > { %s1485_s18 = scalar_lea.hbm %s1994_s26, 16  ;;  %s1489_s21 = scalar_lea.hbm %s2044_s8, 32 }
 0x427   : > { %p1486_p4 = scmp.ne.s32.totalorder %s1994_s26, %s1485_s18  ;;  %p1490_p9 = scmp.lt.u32.totalorder %s1994_s26, %s2044_s8 }
 0x428   : > { %p1491_p10 = scmp.lt.u32.totalorder %s1489_s21, %s1485_s18  ;;  %p1493_p12 = scmp.lt.u32.totalorder %s1485_s18, %s1994_s26 }
 0x429   : > { %p1487_p7 = pnand %p1486_p4, %p1623_p5 }
 0x42a   : > { %p1492_p11 = por %p1491_p10, %p1490_p9 }
 0x42b   : > { %p1488_p8 = pneg %p1487_p7 }
 0x42c   : > { %p1494_p13 = por %p1493_p12, %p1492_p11 }
 0x42e   : > { %p1495_p0 = pnand %p1494_p13, %p1488_p8 }
 0x430   : > { %1498 = shalt.err (!%p1495_p0)
}
 0x431   : > { %1339 = dma.vmem_to_hbm [thread:$0]  (%p1623_p5), %s1996_s23, 16, %s1994_s26, %s1111_s10  }
 0x432 PF: > { %p1345_p1 = scmp.ge.s32.totalorder %s1533_s30, 2  ;;  %s1135_s25 = sand.u32 1, %s1521_s27  }
 0x433   : > { %s1136_s12 = scalar_lea.sflag [#allocation3], %s1135_s25 }
 0x434   : > { %p1342_p2 = pnand %p1345_p1, %p1627_p6 }
 0x436   : > { %1516 = dma.done.wait (!%p1342_p2), %s1136_s12, 16  }
 0x437   : > { %1518 = vsyncadd (!%p1342_p2), %s1136_s12, 4294967280  ;;  %p18_p3 = scmp.ge.s32.totalorder %s1610_s11, 4   ;;  %s2051_s27 = smov %s1525_s28 }
 0x438   : > { %s2052_s28 = smov %s1529_s29  ;;  %s2053_s29 = smov %s1621_s14 }
 0x439   : > { %s2054_s30 = smov %s1610_s11  ;;  %20 = sbr.rel (!%p18_p3) target bundleno = 3 (0x3), region = 87 }
 0x440   :  { %1140 = vsyncpa [#allocation3], 1 }
 0x441   :  { %1142 = vsyncpa [#allocation3 + $0x1], 1 }

</bundles_post_ra>
